<compile_context>
chip_gen: v5e
topology: v5e:2x2
jax: 0.10.0
libtpu: 0.0.40
codegen_flags: <defaults>
</compile_context>

<pallas_src>
import jax
import jax.numpy as jnp
from jax.experimental import pallas as pl
from jax.experimental.pallas import tpu as pltpu

LANE = 128          # pad output (class) dim to one full lane width
NEG_INF = -1e30     # baked into padded bias columns


def _cdiv(a, b):
    return (a + b - 1) // b


def _round_up(n, m):
    return _cdiv(n, m) * m


def _tile_config():
    """Generation-aware (max_tile_b, vmem_limit_bytes)."""
    try:
        vmem = pltpu.get_tpu_info().vmem_capacity_bytes
    except Exception:
        vmem = None
    if vmem is None:
        return 2048, 32 << 20       # unknown backend: conservative, fits all gens
    if vmem >= (100 << 20):         # v5e / v6e: 128 MiB physical VMEM
        return 4096, 64 << 20
    return 4096, 48 << 20           # v7x: 64 MiB physical VMEM


def _mclr_kernel(x_ref, w_ref, b_ref, o_ref):
    # x_ref: (TB, D) f32 (streamed) | w_ref: (D, LANE) bf16 | b_ref: (1, LANE) f32
    # o_ref: (TB, LANE) f32
    x = x_ref[...].astype(jnp.bfloat16)              # cast in VMEM, not in HBM
    logits = jnp.dot(x, w_ref[...],
                     preferred_element_type=jnp.float32) + b_ref[...]
    # Padded class columns already hold logits == -1e30 via the baked bias,
    # so exp() underflows them to exact 0 — no explicit mask needed.
    m = jnp.max(logits, axis=-1, keepdims=True)
    shifted = logits - m
    lse = jnp.log(jnp.sum(jnp.exp(shifted), axis=-1, keepdims=True))
    o_ref[...] = shifted - lse


def prepare_params(weight, bias):
    """One-time prep: torch nn.Linear layout -> lane-padded MXU buffers.

    weight: (output_dim, input_dim), bias: (output_dim,).
    Keep the results persistent across calls (they are ~0.2 MiB total)."""
    O, D = weight.shape
    w_t = jnp.zeros((D, LANE), jnp.bfloat16).at[:, :O].set(
        weight.T.astype(jnp.bfloat16))
    # Bake the class mask into the bias: padded columns get -1e30 (weight
    # padding is 0, so padded logits are exactly -1e30).
    b_pad = jnp.full((1, LANE), NEG_INF, jnp.float32).at[0, :O].set(
        bias.astype(jnp.float32))
    return w_t, b_pad, O


def mclr_logistic_forward_prepared(x, w_t, b_pad, output_dim):
    """Forward with pre-prepared (padded/transposed) parameters."""
    B = x.shape[0]
    x2 = x.reshape(B, -1)                     # torch.flatten(x, 1); no dtype cast
    D = x2.shape[1]
    assert w_t.shape == (D, LANE), (w_t.shape, D)

    max_tile, vmem_limit = _tile_config()
    tile_b = min(max_tile, _round_up(B, 8))
    # Megacore (v7x): make sure non-trivial single-tile batches split into at
    # least 2 grid steps so the "parallel" axis has work for both TensorCores.
    if B >= 1024 and _cdiv(B, tile_b) < 2:
        tile_b = _round_up(_cdiv(B, 2), 8)
    grid = (_cdiv(B, tile_b),)                # ragged last block: stores masked

    cost = pl.CostEstimate(
        flops=2 * B * D * LANE,
        transcendentals=B * (LANE + 1),
        bytes_accessed=(B * D * x2.dtype.itemsize      # x read
                        + D * LANE * 2                  # weight read (bf16)
                        + LANE * 4                      # bias read
                        + B * LANE * 4))                # output write

    out = pl.pallas_call(
        _mclr_kernel,
        out_shape=jax.ShapeDtypeStruct((B, LANE), jnp.float32),
        grid_spec=pltpu.PrefetchScalarGridSpec(
            num_scalar_prefetch=0,
            grid=grid,
            in_specs=[
                pl.BlockSpec((tile_b, D), lambda i: (i, 0)),   # x: streamed per tile
                pl.BlockSpec((D, LANE), lambda i: (0, 0)),     # W: VMEM-resident
                pl.BlockSpec((1, LANE), lambda i: (0, 0)),     # b: VMEM-resident
            ],
            out_specs=pl.BlockSpec((tile_b, LANE), lambda i: (i, 0)),
        ),
        compiler_params=pltpu.CompilerParams(
            dimension_semantics=("parallel",),    # megacore-shardable on v7x
            vmem_limit_bytes=vmem_limit,
        ),
        cost_estimate=cost,
    )(x2, w_t, b_pad)

    # TODO(synk): if this feeds NLL loss / argmax, fuse that reduction into the
    # kernel instead of materializing (B, output_dim) log-probs.
    return out[:, :output_dim]


def mclr_logistic_forward(x, weight, bias):
    """Convenience wrapper matching the torch module signature.

    x: (B, ...) flattened to (B, input_dim); weight: (output_dim, input_dim);
    bias: (output_dim,). Returns f32 log-probabilities of shape (B, output_dim).
    In a training loop, call prepare_params() once and use
    mclr_logistic_forward_prepared() instead."""
    w_t, b_pad, O = prepare_params(weight, bias)
    return mclr_logistic_forward_prepared(x, w_t, b_pad, O)


def init_params(key, input_dim=784, output_dim=10):
    # Mimics torch.nn.Linear default init:
    # uniform(-1/sqrt(in_features), 1/sqrt(in_features)) for weight and bias.
    kw, kb = jax.random.split(key)
    bound = 1.0 / jnp.sqrt(float(input_dim))
    weight = jax.random.uniform(kw, (output_dim, input_dim),
                                minval=-bound, maxval=bound, dtype=jnp.float32)
    bias = jax.random.uniform(kb, (output_dim,),
                              minval=-bound, maxval=bound, dtype=jnp.float32)
    return weight, bias


if __name__ == "__main__":
    key = jax.random.PRNGKey(0)
    k_x, k_p = jax.random.split(key)

    input_dim, output_dim = 784, 10
    batch = 8

    # MNIST-shaped input (B, 1, 28, 28) -> flattened to 784 inside the wrapper.
    x = jax.random.normal(k_x, (batch, 1, 28, 28), dtype=jnp.float32)
    weight, bias = init_params(k_p, input_dim, output_dim)

    # Hoist the tiny parameter prep out of the hot path (production pattern).
    w_t, b_pad, O = prepare_params(weight, bias)
    log_probs = mclr_logistic_forward_prepared(x, w_t, b_pad, O)
    log_probs = jax.block_until_ready(log_probs)

    # Reference check against plain JAX (f32); bf16 matmul path -> loose tol.
    logits_ref = x.reshape(batch, -1) @ weight.T + bias
    ref = jax.nn.log_softmax(logits_ref, axis=-1)

    assert log_probs.shape == (batch, output_dim)
    assert jnp.allclose(log_probs, ref, atol=3e-2, rtol=3e-2), (
        f"max abs err = {jnp.max(jnp.abs(log_probs - ref))}")
    # Sanity: rows are valid log-prob distributions.
    assert jnp.allclose(jnp.sum(jnp.exp(log_probs), axis=-1), 1.0, atol=1e-3)

    print("KERNEL_OK")
</pallas_src>

<mosaic_0001>
module attributes {stable_mosaic.version = 11 : i64} {
  func.func @_mclr_kernel(%arg0: i32, %arg1: memref<8x784xf32, #tpu.memory_space<vmem>>, %arg2: memref<784x128xbf16, #tpu.memory_space<vmem>>, %arg3: memref<1x128xf32, #tpu.memory_space<vmem>>, %arg4: memref<8x128xf32, #tpu.memory_space<vmem>>) attributes {dimension_semantics = [#tpu.dimension_semantics<parallel>], iteration_bounds = array<i64: 1>, scalar_prefetch = 0 : i64, scratch_operands = 0 : i64, tpu.core_type = #tpu.core_type<tc>, window_params = [{transform_indices = @transform_0, window_bounds = array<i64: 8, 784>}, {pipeline_mode = #tpu.pipeline_mode<synchronous>, transform_indices = @transform_1, window_bounds = array<i64: 784, 128>}, {pipeline_mode = #tpu.pipeline_mode<synchronous>, transform_indices = @transform_2, window_bounds = array<i64: 1, 128>}, {transform_indices = @transform_3, window_bounds = array<i64: 8, 128>}]} {
    %c0 = arith.constant 0 : index
    %c0_0 = arith.constant 0 : index
    %0 = vector.load %arg1[%c0, %c0_0] : memref<8x784xf32, #tpu.memory_space<vmem>>, vector<8x784xf32>
    %1 = arith.truncf %0 : vector<8x784xf32> to vector<8x784xbf16>
    %c0_1 = arith.constant 0 : index
    %c0_2 = arith.constant 0 : index
    %2 = vector.load %arg2[%c0_1, %c0_2] : memref<784x128xbf16, #tpu.memory_space<vmem>>, vector<784x128xbf16>
    %cst = arith.constant dense<0.000000e+00> : vector<8x128xf32>
    %3 = tpu.matmul %1, %2, %cst {dimension_numbers = #tpu.dot_dimension_numbers<[1], [0], [0], [1], [0, 0, 1, 1], [], []>} : vector<8x784xbf16>, vector<784x128xbf16>, vector<8x128xf32> -> vector<8x128xf32>
    %c0_3 = arith.constant 0 : index
    %c0_4 = arith.constant 0 : index
    %4 = vector.load %arg3[%c0_3, %c0_4] : memref<1x128xf32, #tpu.memory_space<vmem>>, vector<1x128xf32>
    %5 = vector.broadcast %4 : vector<1x128xf32> to vector<8x128xf32>
    %6 = arith.addf %3, %5 : vector<8x128xf32>
    %cst_5 = arith.constant dense<0xFF800000> : vector<8xf32>
    %7 = vector.multi_reduction <maximumf>, %6, %cst_5 [1] : vector<8x128xf32> to vector<8xf32>
    %8 = vector.shape_cast %7 : vector<8xf32> to vector<8x1xf32>
    %9 = vector.broadcast %8 : vector<8x1xf32> to vector<8x128xf32>
    %10 = arith.subf %6, %9 : vector<8x128xf32>
    %11 = math.exp %10 : vector<8x128xf32>
    %cst_6 = arith.constant dense<0.000000e+00> : vector<8xf32>
    %12 = vector.multi_reduction <add>, %11, %cst_6 [1] : vector<8x128xf32> to vector<8xf32>
    %13 = vector.shape_cast %12 : vector<8xf32> to vector<8x1xf32>
    %14 = math.log %13 : vector<8x1xf32>
    %15 = vector.broadcast %14 : vector<8x1xf32> to vector<8x128xf32>
    %16 = arith.subf %10, %15 : vector<8x128xf32>
    %c0_7 = arith.constant 0 : index
    %c0_8 = arith.constant 0 : index
    %17 = vector.load %arg4[%c0_7, %c0_8] : memref<8x128xf32, #tpu.memory_space<vmem>>, vector<8x128xf32>
    tpu.vector_store %arg4[%c0_7, %c0_8], %16 {strides = array<i32>} : memref<8x128xf32, #tpu.memory_space<vmem>>, vector<8x128xf32>,
    return
  }
  func.func @transform_0(%arg0: i32) -> (i32, i32) {
    %c0_i32 = arith.constant 0 : i32
    %c0_i32_0 = arith.constant 0 : i32
    return %arg0, %c0_i32 : i32, i32
  }
  func.func @transform_1(%arg0: i32) -> (i32, i32) {
    %c0_i32 = arith.constant 0 : i32
    %c0_i32_0 = arith.constant 0 : i32
    %c0_i32_1 = arith.constant 0 : i32
    return %c0_i32, %c0_i32_0 : i32, i32
  }
  func.func @transform_2(%arg0: i32) -> (i32, i32) {
    %c0_i32 = arith.constant 0 : i32
    %c0_i32_0 = arith.constant 0 : i32
    %c0_i32_1 = arith.constant 0 : i32
    return %c0_i32, %c0_i32_0 : i32, i32
  }
  func.func @transform_3(%arg0: i32) -> (i32, i32) {
    %c0_i32 = arith.constant 0 : i32
    %c0_i32_0 = arith.constant 0 : i32
    return %arg0, %c0_i32 : i32, i32
  }
}

</mosaic_0001>

<bundles_post_ra>
// kernel: tpu_custom_call.1
= control target key start
LH: loop header
LB: loop body
LE: loop exit
PB: predicated region body
PF: predicated region fallthrough
CT: control target
= control target key end

     0   :  { %8 = vsyncpa [#allocation3], 0  ;;  %s951_s0 = inlined_call_operand.hbm [shape: f32[8,784], index: 0, kind: input, shape index: {}]   ;;  %s952_s1 = inlined_call_operand.hbm [shape: bf16[784,128], index: 1, kind: input, shape index: {}]   ;;  %s953_s2 = inlined_call_operand.vmem [shape: f32[1,128], index: 2, kind: input, shape index: {}]   ;;  %s954_s3 = inlined_call_operand.hbm [shape: f32[8,128], index: 3, kind: output, shape index: {}]  }
   0x1   :  { %9 = vsyncpa [#allocation6], 0 }
   0x2   :  { %10 = vsyncpa [#allocation4], 0  ;;  %s16_s14 = sshll.u32 %s951_s0, 4  ;;  %s914_s15 = smov [#allocation2]   ;;  %s17_s14 = int_to_ptr.hbm [resolvable:$true] %s16_s14 }
   0x3   :  { %s18_s16 = sshll.u32 %s914_s15, 4  ;;  %s26_s19 = sshll.u32 %s952_s1, 4  ;;  %s19_s16 = int_to_ptr.vmem [resolvable:$true] %s18_s16  ;;  %s27_s19 = int_to_ptr.hbm [resolvable:$true] %s26_s19 }
   0x4   :  { %21 = dma.hbm_to_vmem [thread:$0]  %s17_s14, 896, %s19_s16, [#allocation3]  }
   0x5   :  { %s915_s20 = smov [#allocation5]   ;;  %s916_s22 = smov 64  }
   0x6   :  { %s28_s21 = sshll.u32 %s915_s20, 4  ;;  %s917_s23 = smov 4   ;;  %s29_s21 = int_to_ptr.vmem [resolvable:$true] %s28_s21 }
   0x7   :  { %34 = dma.hbm_to_vmem [thread:$0]  %s27_s19, 6272, %s29_s21, [#allocation6], %s916_s22, %s916_s22, %s917_s23  }
   0x8   :  { %908 = dma.done.wait [#allocation3], 896  }
   0x9   :  { %909 = vsyncadd [#allocation3], 4294966400 }
   0xa   :  { %910 = dma.done.wait [#allocation6], 6272  }
   0xb   :  { %911 = vsyncadd [#allocation6], 4294961024  ;;  %v784_v0 = vld [vmem:[#allocation5 + $0x38] sm:$0xff]  ;;  %v783_v3 = vld [vmem:[#allocation5 + $0x30] sm:$0xff]  ;;  %vm456_vm0 = vcmask 130048   ;;  %s569_s27 = sshll.u32 %s954_s3, 4  ;;  %s570_s27 = int_to_ptr.hbm [resolvable:$true] %s569_s27 }
   0xc   :  { %v792_v1 = vld [vmem:[#allocation5 + $0x78] sm:$0xff]  ;;  %460 = vmatpush.bf16.msra.mxu0 %v784_v0  ;;  %v791_v4 = vld [vmem:[#allocation5 + $0x70] sm:$0xff]  ;;  %v782_v8 = vld [vmem:[#allocation5 + $0x28] sm:$0xff] }
   0xd   :  { %v800_v2 = vld [vmem:[#allocation5 + $0xb8] sm:$0xff]  ;;  %473 = vmatpush.bf16.msra.mxu1 %v792_v1  ;;  %v799_v5 = vld [vmem:[#allocation5 + $0xb0] sm:$0xff]  ;;  %v790_v9 = vld [vmem:[#allocation5 + $0x68] sm:$0xff] }
   0xe   :  { %486 = vmatpush.bf16.msra.mxu2 %v800_v2  ;;  %v808_v6 = vld [vmem:[#allocation5 + $0xf8] sm:$0xff]  ;;  %v807_v7 = vld [vmem:[#allocation5 + $0xf0] sm:$0xff]  ;;  %v798_v10 = vld [vmem:[#allocation5 + $0xa8] sm:$0xff] }
   0xf   :  { %499 = vmatpush.bf16.msra.mxu3 %v808_v6  ;;  %v806_v11 = vld [vmem:[#allocation5 + $0xe8] sm:$0xff]  ;;  %v781_v12 = vld [vmem:[#allocation5 + $0x20] sm:$0xff]  ;;  %v780_v16 = vld [vmem:[#allocation5 + $0x18] sm:$0xff] }
  0x10   :  { %461 = vmatpush.bf16.msra.mxu0 %v783_v3  ;;  %v789_v13 = vld [vmem:[#allocation5 + $0x60] sm:$0xff]  ;;  %v788_v17 = vld [vmem:[#allocation5 + $0x58] sm:$0xff]  ;;  %v779_v20 = vld [vmem:[#allocation5 + $0x10] sm:$0xff] }
  0x11   :  { %474 = vmatpush.bf16.msra.mxu1 %v791_v4  ;;  %v797_v14 = vld [vmem:[#allocation5 + $0xa0] sm:$0xff]  ;;  %v796_v18 = vld [vmem:[#allocation5 + $0x98] sm:$0xff]  ;;  %v787_v21 = vld [vmem:[#allocation5 + $0x50] sm:$0xff] }
  0x12   :  { %487 = vmatpush.bf16.msra.mxu2 %v799_v5  ;;  %v805_v15 = vld [vmem:[#allocation5 + $0xe0] sm:$0xff]  ;;  %v804_v19 = vld [vmem:[#allocation5 + $0xd8] sm:$0xff]  ;;  %v795_v22 = vld [vmem:[#allocation5 + $0x90] sm:$0xff] }
  0x13   :  { %500 = vmatpush.bf16.msra.mxu3 %v807_v7  ;;  %v803_v23 = vld [vmem:[#allocation5 + $0xd0] sm:$0xff]  ;;  %v778_v24 = vld [vmem:[#allocation5 + $0x8] sm:$0xff]  ;;  %v777_v27 = vld [vmem:[#allocation5] sm:$0xff] }
  0x14   :  { %462 = vmatpush.bf16.msra.mxu0 %v782_v8  ;;  %v786_v25 = vld [vmem:[#allocation5 + $0x48] sm:$0xff]  ;;  %v785_v29 = vld [vmem:[#allocation5 + $0x40] sm:$0xff]  ;;  %v47_v31 = vld [vmem:[#allocation2 + $0x8] sm:$0xff] }
  0x15   :  { %475 = vmatpush.bf16.msra.mxu1 %v790_v9  ;;  %v794_v26 = vld [vmem:[#allocation5 + $0x88] sm:$0xff]  ;;  %v816_v32 = vld [vmem:[#allocation5 + $0x138] sm:$0xff]  ;;  %v793_v34 = vld [vmem:[#allocation5 + $0x80] sm:$0xff]  ;;  %v54_v37 = vpack.c.bf16 %v47_v31, %v47_v31 }
  0x16   :  { %488 = vmatpush.bf16.msra.mxu2 %v798_v10  ;;  %v802_v28 = vld [vmem:[#allocation5 + $0xc8] sm:$0xff]  ;;  %v824_v33 = vld [vmem:[#allocation5 + $0x178] sm:$0xff]  ;;  %v801_v38 = vld [vmem:[#allocation5 + $0xc0] sm:$0xff] }
  0x17   :  { %501 = vmatpush.bf16.msra.mxu3 %v806_v11  ;;  %v46_v30 = vld [vmem:[#allocation2] sm:$0xff]  ;;  %v48_v35 = vld [vmem:[#allocation2 + $0x10] sm:$0xff]  ;;  %v825_v39 = vld [vmem:[#allocation5 + $0x180] sm:$0xff] }
  0x18   :  { %463 = vmatpush.bf16.msra.mxu0 %v781_v12  ;;  %v53_v36 = vpack.c.bf16 %v46_v30, %v46_v30  ;;  %v49_v40 = vld [vmem:[#allocation2 + $0x18] sm:$0xff]  ;;  %v815_v41 = vld [vmem:[#allocation5 + $0x130] sm:$0xff]  ;;  %v55_v43 = vpack.c.bf16 %v48_v35, %v48_v35  ;;  %v814_v45 = vld [vmem:[#allocation5 + $0x128] sm:$0xff] }
  0x19   :  { %476 = vmatpush.bf16.msra.mxu1 %v789_v13  ;;  %v823_v42 = vld [vmem:[#allocation5 + $0x170] sm:$0xff]  ;;  %v56_v44 = vpack.c.bf16 %v49_v40, %v49_v40  ;;  %v822_v46 = vld [vmem:[#allocation5 + $0x168] sm:$0xff]  ;;  %v813_v47 = vld [vmem:[#allocation5 + $0x120] sm:$0xff] }
  0x1a   :  { %489 = vmatpush.bf16.msra.mxu2 %v797_v14  ;;  %v821_v48 = vld [vmem:[#allocation5 + $0x160] sm:$0xff]  ;;  %v812_v49 = vld [vmem:[#allocation5 + $0x118] sm:$0xff]  ;;  %v811_v52 = vld [vmem:[#allocation5 + $0x110] sm:$0xff] }
  0x1b   :  { %502 = vmatpush.bf16.msra.mxu3 %v805_v15  ;;  %v820_v50 = vld [vmem:[#allocation5 + $0x158] sm:$0xff]  ;;  %v819_v53 = vld [vmem:[#allocation5 + $0x150] sm:$0xff]  ;;  %v810_v55 = vld [vmem:[#allocation5 + $0x108] sm:$0xff] }
  0x1c   :  { %464 = vmatpush.bf16.msra.mxu0 %v780_v16  ;;  %v52_v51 = vld [vmem:[#allocation2 + $0x30] sm:$0xff]  ;;  %v818_v56 = vld [vmem:[#allocation5 + $0x148] sm:$0xff]  ;;  %v809_v57 = vld [vmem:[#allocation5 + $0x100] sm:$0xff] }
  0x1d   :  { %477 = vmatpush.bf16.msra.mxu1 %v788_v17  ;;  %v59_v54 = vpack.c.bf16 %v52_v51, %v52_v51  ;;  %v817_v58 = vld [vmem:[#allocation5 + $0x140] sm:$0xff]  ;;  %v50_v59 = vld [vmem:[#allocation2 + $0x20] sm:$0xff]  ;;  %v51_v60 = vld [vmem:[#allocation2 + $0x28] sm:$0xff] }
  0x1e   :  { %490 = vmatpush.bf16.msra.mxu2 %v796_v18  ;;  %v57_v61 = vpack.c.bf16 %v50_v59, %v50_v59  ;;  %v58_v62 = vpack.c.bf16 %v51_v60, %v51_v60  ;;  %v831_v5 = vld [vmem:[%s953_s2] ss:$0 sm:$0xff]  ;;  %s918_s2 = smov [#allocation7]  }
  0x1f   :  { %503 = vmatpush.bf16.msra.mxu3 %v804_v19  ;;  %s567_s24 = sshll.u32 %s918_s2, 4  ;;  %s568_s24 = int_to_ptr.vmem [resolvable:$true] %s567_s24 }
  0x20   :  { %465 = vmatpush.bf16.msra.mxu0 %v779_v20 }
  0x21   :  { %478 = vmatpush.bf16.msra.mxu1 %v787_v21 }
  0x22   :  { %491 = vmatpush.bf16.msra.mxu2 %v795_v22 }
  0x23   :  { %504 = vmatpush.bf16.msra.mxu3 %v803_v23 }
  0x24   :  { %466 = vmatpush.bf16.msra.mxu0 %v778_v24 }
  0x25   :  { %479 = vmatpush.bf16.msra.mxu1 %v786_v25 }
  0x26   :  { %492 = vmatpush.bf16.msra.mxu2 %v794_v26 }
  0x27   :  { %505 = vmatpush.bf16.msra.mxu3 %v802_v28 }
  0x28   :  { %467 = vmatpush.bf16.msra.mxu0 %v777_v27 }
  0x29   :  { %480 = vmatpush.bf16.msra.mxu1 %v785_v29 }
  0x2a   :  { %493 = vmatpush.bf16.msra.mxu2 %v793_v34 }
  0x2b   :  { %468 = vmatmul.bf16.vlgmr.msra.gmra.mxu0 %v53_v36  ;;  %506 = vmatpush.bf16.msra.mxu3 %v801_v38 }
  0x2c   :  { %512 = vmatpush.bf16.msrb.mxu0 %v816_v32  ;;  %481 = vmatmul.bf16.vlgmr.msra.gmra.mxu1 %v54_v37 }
  0x2d   :  { %525 = vmatpush.bf16.msrb.mxu1 %v824_v33  ;;  %494 = vmatmul.bf16.vlgmr.msra.gmra.mxu2 %v55_v43 }
  0x2e   :  { %545 = vmatpush.bf16.msrb.mxu2 %v825_v39  ;;  %507 = vmatmul.bf16.vlgmr.msra.gmra.mxu3 %v56_v44 }
  0x30   :  { %513 = vmatpush.bf16.msrb.mxu0 %v815_v41 }
  0x31   :  { %526 = vmatpush.bf16.msrb.mxu1 %v823_v42 }
  0x34   :  { %514 = vmatpush.bf16.msrb.mxu0 %v814_v45 }
  0x35   :  { %527 = vmatpush.bf16.msrb.mxu1 %v822_v46 }
  0x38   :  { %515 = vmatpush.bf16.msrb.mxu0 %v813_v47 }
  0x39   :  { %528 = vmatpush.bf16.msrb.mxu1 %v821_v48 }
  0x3c   :  { %516 = vmatpush.bf16.msrb.mxu0 %v812_v49 }
  0x3d   :  { %529 = vmatpush.bf16.msrb.mxu1 %v820_v50  ;;  %776 = vmatmul.msk.bf16.vlgmr.msrb.gmra.mxu2 %vm456_vm0, %v59_v54 }
  0x40   :  { %517 = vmatpush.bf16.msrb.mxu0 %v811_v52 }
  0x41   :  { %530 = vmatpush.bf16.msrb.mxu1 %v819_v53 }
  0x44   :  { %518 = vmatpush.bf16.msrb.mxu0 %v810_v55 }
  0x45   :  { %531 = vmatpush.bf16.msrb.mxu1 %v818_v56 }
  0x48   :  { %519 = vmatpush.bf16.msrb.mxu0 %v809_v57 }
  0x49   :  { %532 = vmatpush.bf16.msrb.mxu1 %v817_v58 }
  0x4b   :  { %520 = vmatmul.bf16.vlgmr.msrb.gmra.mxu0 %v57_v61 }
  0x4c   :  { %533 = vmatmul.bf16.vlgmr.msrb.gmra.mxu1 %v58_v62 }
  0xa8   :  { %v469_v63 = vpop.f32.mrf.mxu0 }
  0xa9   :  { %v482_v0 = vpop.f32.mrf.mxu1  ;;  %v470_v6 = vadd.f32 %v831_v5, %v469_v63 }
  0xab   :  { %v483_v9 = vadd.f32 %v482_v0, %v470_v6 }
  0xb0   :  { %v471_v1 = vpop.f32.mrf.mxu0  ;;  %v495_v3 = vpop.f32.mrf.mxu2 }
  0xb1   :  { %v484_v2 = vpop.f32.mrf.mxu1  ;;  %v508_v4 = vpop.f32.mrf.mxu3  ;;  %v496_v10 = vadd.f32 %v495_v3, %v483_v9 }
  0xb3   :  { %v509_v12 = vadd.f32 %v508_v4, %v496_v10 }
  0xb8   :  { %v497_v7 = vpop.f32.mrf.mxu2 }
  0xb9   :  { %v510_v8 = vpop.f32.mrf.mxu3 }
  0xc0   :  { %v547_v11 = vpop.f32.mrf.mxu2 }
  0xc8   :  { %v521_v13 = vpop.f32.mrf.mxu0  ;;  %v549_v17 = vpop.f32.mrf.mxu2 }
  0xc9   :  { %v534_v14 = vpop.f32.mrf.mxu1  ;;  %v522_v15 = vadd.f32 %v521_v13, %v509_v12 }
  0xcb   :  { %v535_v16 = vadd.f32 %v534_v14, %v522_v15 }
  0xcd   :  { %v548_v18 = vadd.f32 %v547_v11, %v535_v16 }
  0xcf   :  { %551 = vmax.xlane.f32.xlu0 %v548_v18 }
  0xd0   :  { %v523_v19 = vpop.f32.mrf.mxu0 }
  0xd1   :  { %v536_v20 = vpop.f32.mrf.mxu1 }
 0x142   :  { %v552_v21 = vpop.xlane.xlu0 %551 }
 0x143   :  { %v553_v22 = vsub.f32 %v548_v18, %v552_v21 }
 0x145   :  { %v554_v23 = vmul.f32 1.442695, %v553_v22 }
 0x147   :  { %832 = vpow2.f32 %v554_v23 }
 0x14d   :  { %v833_v24 = vpop.eup %832 }
 0x14e   :  { %556 = vadd.xlane.f32.xlu0 %v833_v24 }
 0x1c1   :  { %v557_v25 = vpop.xlane.xlu0 %556 }
 0x1c2   :  { %834 = vlog2.f32 %v557_v25 }
 0x1c8   :  { %v835_v26 = vpop.eup %834 }
 0x1c9   :  { %v559_v27 = vmul.f32 0.6931472, %v835_v26 }
 0x1cb   :  { %v560_v28 = vsub.f32 %v553_v22, %v559_v27 }
 0x1cd   :  { %561 = vst [vmem:[#allocation7] sm:$0xff] %v560_v28 }
 0x1ce   :  { %572 = dma.vmem_to_hbm [thread:$0]  %s568_s24, 128, %s570_s27, [#allocation4]  }
 0x1cf   :  { %912 = dma.done.wait [#allocation4], 128  }
 0x1d0   :  { %913 = vsyncadd [#allocation4], 4294967168 }
 0x1d1   :  { %577 = vsyncpa [#allocation3], 1 }
 0x1d2   :  { %578 = vsyncpa [#allocation6], 1 }
 0x1d3   :  { %579 = vsyncpa [#allocation4], 1 }

</bundles_post_ra>
